<compile_context>
chip_gen: v6e
topology: v6e:2x2x1
jax: 0.10.0
libtpu: 0.0.40
codegen_flags: <defaults>
</compile_context>

<pallas_src>
import jax
import jax.numpy as jnp
from jax.experimental import pallas as pl
from jax.experimental.pallas import tpu as pltpu

EPS = 1e-3


def _bn_kernel(x_ref, w_ref, b_ref, o_ref):
    # x_ref / o_ref: [Ct, HW] (batch dim squeezed) or [N, Ct, HW]
    # w_ref / b_ref: [C, 1]   (untiled; sliced per channel-tile)
    if x_ref.ndim == 2:
        ct, hw = x_ref.shape
        n_elems = hw
        red_axes = (1,)
    else:
        n, ct, hw = x_ref.shape
        n_elems = n * hw
        red_axes = (0, 2)
    inv_n = jnp.float32(1.0 / n_elems)

    c0 = pl.multiple_of(pl.program_id(0) * ct, ct)
    w = w_ref[pl.ds(c0, ct), :].astype(jnp.float32)        # [Ct, 1]
    b = b_ref[pl.ds(c0, ct), :].astype(jnp.float32)        # [Ct, 1]
    if x_ref.ndim == 3:
        w = w[None]                                        # [1, Ct, 1]
        b = b[None]

    # Pass 1: per-channel mean (tile re-read below keeps vreg pressure low).
    mean = jnp.sum(x_ref[...].astype(jnp.float32),
                   axis=red_axes, keepdims=True) * inv_n

    # Pass 2: two-pass (centered) variance — re-read the resident VMEM tile.
    xc = x_ref[...].astype(jnp.float32) - mean
    var = jnp.sum(xc * xc, axis=red_axes, keepdims=True) * inv_n
    inv_std = jax.lax.rsqrt(var + EPS)

    scale = w * inv_std                                    # [.., Ct, 1]
    shift = b - mean * scale                               # [.., Ct, 1]

    # Pass 3: normalize; re-read x_ref instead of keeping it live since pass 1.
    o_ref[...] = (x_ref[...].astype(jnp.float32) * scale
                  + shift).astype(o_ref.dtype)


def _pick_c_tile(n, c, hw_pad, itemsize, target_block_bytes=2 * 1024 * 1024):
    """Largest divisor of C that (a) is C itself or a multiple of 8 (sublane
    layout), (b) keeps the lane-padded block within the per-block byte target,
    and (c) preferably leaves >= 2 grid steps (megacore sharding + pipeline
    overlap)."""
    legal = sorted(d for d in range(1, c + 1)
                   if c % d == 0 and (d == c or d % 8 == 0))
    if not legal:
        legal = [c]
    block_bytes = lambda d: n * d * hw_pad * itemsize
    fitting = [d for d in legal if block_bytes(d) <= target_block_bytes]
    if not fitting:
        return legal[0]
    multi_step = [d for d in fitting if c // d >= 2]
    return max(multi_step) if multi_step else max(fitting)


def batchnorm2d(x_nchw, weight, bias):
    """x_nchw: [N, C, H, W]; weight/bias: [C].  Returns [N, C, H, W]."""
    N, C, H, W = x_nchw.shape
    HW = H * W
    itemsize = jnp.dtype(x_nchw.dtype).itemsize
    hw_pad = pl.cdiv(HW, 128) * 128          # lane padding of the last dim

    ct = _pick_c_tile(N, C, hw_pad, itemsize)
    grid = (C // ct,)

    w2 = weight.reshape(C, 1)
    b2 = bias.reshape(C, 1)

    if N == 1:
        # Free reshape (no transpose / relayout): [1, C, H, W] -> [C, HW].
        x_view = x_nchw.reshape(C, HW)
        x_spec = pl.BlockSpec((ct, HW), lambda i: (i, 0))
        o_spec = pl.BlockSpec((ct, HW), lambda i: (i, 0))
        out_shape = jax.ShapeDtypeStruct((C, HW), x_nchw.dtype)
    else:
        x_view = x_nchw.reshape(N, C, HW)
        x_spec = pl.BlockSpec((N, ct, HW), lambda i: (0, i, 0))
        o_spec = pl.BlockSpec((N, ct, HW), lambda i: (0, i, 0))
        out_shape = jax.ShapeDtypeStruct((N, C, HW), x_nchw.dtype)

    # VMEM budget: double-buffered input + output tiles (lane-padded) plus the
    # two untiled (C, 1) parameter buffers (lane dim padded 1 -> 128).
    block_padded = N * ct * hw_pad * itemsize
    c_pad = pl.cdiv(C, 8) * 8
    param_padded = 2 * c_pad * 128 * jnp.dtype(weight.dtype).itemsize
    vmem_needed = 4 * block_padded + 2 * param_padded + (1 << 20)
    vmem_limit = int(min(max(vmem_needed, 8 * 1024 * 1024),
                         32 * 1024 * 1024))

    cost = pl.CostEstimate(
        flops=7 * N * C * HW,
        transcendentals=C,
        bytes_accessed=2 * N * C * HW * itemsize + 2 * C * 4,
    )

    param_spec = pl.BlockSpec((C, 1), lambda i: (0, 0))

    y = pl.pallas_call(
        _bn_kernel,
        grid=grid,
        in_specs=[x_spec, param_spec, param_spec],
        out_specs=o_spec,
        out_shape=out_shape,
        compiler_params=pltpu.CompilerParams(
            dimension_semantics=("parallel",),
            vmem_limit_bytes=vmem_limit,
        ),
        cost_estimate=cost,
    )(x_view, w2, b2)

    return y.reshape(N, C, H, W)


def _reference(x_nchw, weight, bias):
    xf = x_nchw.astype(jnp.float32)
    mean = jnp.mean(xf, axis=(0, 2, 3), keepdims=True)
    var = jnp.mean((xf - mean) ** 2, axis=(0, 2, 3), keepdims=True)
    y = (xf - mean) * jax.lax.rsqrt(var + EPS)
    y = y * weight.reshape(1, -1, 1, 1) + bias.reshape(1, -1, 1, 1)
    return y.astype(x_nchw.dtype)


if __name__ == "__main__":
    key = jax.random.PRNGKey(0)
    kx, kw, kb = jax.random.split(key, 3)

    N, C, H, W = 1, 256, 7, 7  # matches the PyTorch module's input shape
    x = jax.random.normal(kx, (N, C, H, W), dtype=jnp.float32)
    # Deterministic, non-trivial affine parameters (BatchNorm2d(256) shapes).
    weight = 1.0 + 0.1 * jax.random.normal(kw, (C,), dtype=jnp.float32)
    bias = 0.1 * jax.random.normal(kb, (C,), dtype=jnp.float32)

    out = jax.block_until_ready(batchnorm2d(x, weight, bias))

    ref = _reference(x, weight, bias)
    assert out.shape == (N, C, H, W)
    assert jnp.allclose(out, ref, atol=1e-4, rtol=1e-4)
    print("KERNEL_OK")
</pallas_src>

<mosaic_0001>
module attributes {stable_mosaic.version = 11 : i64} {
  func.func @_bn_kernel(%arg0: i32, %arg1: memref<128x49xf32, #tpu.memory_space<vmem>>, %arg2: memref<256x1xf32, #tpu.memory_space<vmem>>, %arg3: memref<256x1xf32, #tpu.memory_space<vmem>>, %arg4: memref<128x49xf32, #tpu.memory_space<vmem>>) attributes {dimension_semantics = [#tpu.dimension_semantics<parallel>], iteration_bounds = array<i64: 2>, scalar_prefetch = 0 : i64, scratch_operands = 0 : i64, tpu.core_type = #tpu.core_type<tc>, window_params = [{transform_indices = @transform_0, window_bounds = array<i64: 128, 49>}, {pipeline_mode = #tpu.pipeline_mode<synchronous>, transform_indices = @transform_1, window_bounds = array<i64: 256, 1>}, {pipeline_mode = #tpu.pipeline_mode<synchronous>, transform_indices = @transform_2, window_bounds = array<i64: 256, 1>}, {transform_indices = @transform_3, window_bounds = array<i64: 128, 49>}]} {
    %c128_i32 = arith.constant 128 : i32
    %0 = arith.muli %arg0, %c128_i32 : i32
    %1 = tpu.assume_multiple %0, 128 : i32
    %2 = arith.index_cast %1 : i32 to index
    %c0 = arith.constant 0 : index
    %3 = vector.load %arg2[%2, %c0] : memref<256x1xf32, #tpu.memory_space<vmem>>, vector<128x1xf32>
    %4 = arith.index_cast %1 : i32 to index
    %c0_0 = arith.constant 0 : index
    %5 = vector.load %arg3[%4, %c0_0] : memref<256x1xf32, #tpu.memory_space<vmem>>, vector<128x1xf32>
    %c0_1 = arith.constant 0 : index
    %c0_2 = arith.constant 0 : index
    %6 = vector.load %arg1[%c0_1, %c0_2] : memref<128x49xf32, #tpu.memory_space<vmem>>, vector<128x49xf32>
    %cst = arith.constant dense<0.000000e+00> : vector<128xf32>
    %7 = vector.multi_reduction <add>, %6, %cst [1] : vector<128x49xf32> to vector<128xf32>
    %8 = vector.shape_cast %7 : vector<128xf32> to vector<128x1xf32>
    %cst_3 = arith.constant 0.0204081628 : f32
    %9 = vector.broadcast %cst_3 : f32 to vector<128x1xf32>
    %10 = arith.mulf %8, %9 : vector<128x1xf32>
    %c0_4 = arith.constant 0 : index
    %c0_5 = arith.constant 0 : index
    %11 = vector.load %arg1[%c0_4, %c0_5] : memref<128x49xf32, #tpu.memory_space<vmem>>, vector<128x49xf32>
    %12 = vector.broadcast %10 : vector<128x1xf32> to vector<128x49xf32>
    %13 = arith.subf %11, %12 : vector<128x49xf32>
    %14 = arith.mulf %13, %13 : vector<128x49xf32>
    %cst_6 = arith.constant dense<0.000000e+00> : vector<128xf32>
    %15 = vector.multi_reduction <add>, %14, %cst_6 [1] : vector<128x49xf32> to vector<128xf32>
    %16 = vector.shape_cast %15 : vector<128xf32> to vector<128x1xf32>
    %cst_7 = arith.constant 0.0204081628 : f32
    %17 = vector.broadcast %cst_7 : f32 to vector<128x1xf32>
    %18 = arith.mulf %16, %17 : vector<128x1xf32>
    %cst_8 = arith.constant 1.000000e-03 : f32
    %19 = vector.broadcast %cst_8 : f32 to vector<128x1xf32>
    %20 = arith.addf %18, %19 : vector<128x1xf32>
    %21 = math.rsqrt %20 : vector<128x1xf32>
    %22 = arith.mulf %3, %21 : vector<128x1xf32>
    %23 = arith.mulf %10, %22 : vector<128x1xf32>
    %24 = arith.subf %5, %23 : vector<128x1xf32>
    %c0_9 = arith.constant 0 : index
    %c0_10 = arith.constant 0 : index
    %25 = vector.load %arg1[%c0_9, %c0_10] : memref<128x49xf32, #tpu.memory_space<vmem>>, vector<128x49xf32>
    %26 = vector.broadcast %22 : vector<128x1xf32> to vector<128x49xf32>
    %27 = arith.mulf %25, %26 : vector<128x49xf32>
    %28 = vector.broadcast %24 : vector<128x1xf32> to vector<128x49xf32>
    %29 = arith.addf %27, %28 : vector<128x49xf32>
    %c0_11 = arith.constant 0 : index
    %c0_12 = arith.constant 0 : index
    %30 = vector.load %arg4[%c0_11, %c0_12] : memref<128x49xf32, #tpu.memory_space<vmem>>, vector<128x49xf32>
    tpu.vector_store %arg4[%c0_11, %c0_12], %29 {strides = array<i32>} : memref<128x49xf32, #tpu.memory_space<vmem>>, vector<128x49xf32>,
    return
  }
  func.func @transform_0(%arg0: i32) -> (i32, i32) {
    %c0_i32 = arith.constant 0 : i32
    %c0_i32_0 = arith.constant 0 : i32
    return %arg0, %c0_i32 : i32, i32
  }
  func.func @transform_1(%arg0: i32) -> (i32, i32) {
    %c0_i32 = arith.constant 0 : i32
    %c0_i32_0 = arith.constant 0 : i32
    %c0_i32_1 = arith.constant 0 : i32
    return %c0_i32, %c0_i32_0 : i32, i32
  }
  func.func @transform_2(%arg0: i32) -> (i32, i32) {
    %c0_i32 = arith.constant 0 : i32
    %c0_i32_0 = arith.constant 0 : i32
    %c0_i32_1 = arith.constant 0 : i32
    return %c0_i32, %c0_i32_0 : i32, i32
  }
  func.func @transform_3(%arg0: i32) -> (i32, i32) {
    %c0_i32 = arith.constant 0 : i32
    %c0_i32_0 = arith.constant 0 : i32
    return %arg0, %c0_i32 : i32, i32
  }
}

</mosaic_0001>

<bundles_post_ra>
// kernel: tpu_custom_call.1
= control target key start
LH: loop header
LB: loop body
LE: loop exit
PB: predicated region body
PF: predicated region fallthrough
CT: control target
= control target key end

     0   :  { %s818_s12 = smov 0   ;;  %s1140_s0 = inlined_call_operand.vmem [shape: f32[256,49], index: 0, kind: input, shape index: {}]   ;;  %s1141_s1 = inlined_call_operand.vmem [shape: f32[256,1], index: 1, kind: input, shape index: {}]   ;;  %s1142_s2 = inlined_call_operand.vmem [shape: f32[256,1], index: 2, kind: input, shape index: {}]   ;;  %s1143_s3 = inlined_call_operand.vmem [shape: f32[256,49], index: 3, kind: output, shape index: {}]  }
   0x1 LB: > { %s734_s13 = sadd.s32 4294967295, %s795_s12   ;;  %p738_p0 = scmp.ge.s32.totalorder %s795_s12, 1  ;;  %s795_s12 = sphi %s818_s12, %s13_s12  }
   0x2   : > { %p138_p1 = scmp.lt.s32.totalorder %s795_s12, 3 }
   0x4   : > { %p139_p2 = pnand %p738_p0, %p138_p1 }
   0x5   : > { %s739_s14 = sshll.u32 (!%p139_p2), %s734_s13, 4  ;;  %s1000_s19 = sshll.u32 (!%p139_p2), %s734_s13, 7 }
   0x6   : > { %142 = sbr.rel (%p139_p2) target bundleno = 522 (0x20a), region = 32  ;;  %p163_p3 = scmp.lt.s32.totalorder (!%p139_p2), %s739_s14, 31 }
   0x7   : > { %s1006_s22 = scalar_lea.vmem (!%p139_p2), %s1141_s1, %s1000_s19  ;;  %s1040_s25 = scalar_lea.vmem (!%p139_p2), %s1142_s2, %s1000_s19 }
   0xb   : > { %s1145_s14 = smov (!%p163_p3, %s739_s14), 31  ;;  %vm225_vm0 = vcmask 400384  }
   0xc   : > { %s740_s15 = sshll.u32 %s1145_s14, 3 }
   0xd   : > { %s836_s18 = scalar_lea.vmem %s1140_s0, %s740_s15  ;;  %s1088_s28 = scalar_lea.vmem %s1143_s3, %s740_s15 }
   0xe   : > { %v839_v0 = vld [vmem:[%s836_s18] sm:$0xff]  ;;  %v842_v1 = vld [vmem:[%s836_s18 + $0x10] sm:$0xff]  ;;  %v845_v2 = vld [vmem:[%s836_s18 + $0x8] sm:$0xff] }
   0xf   : > { %v226_v3 = vsel %vm225_vm0, %v839_v0, 0.0  ;;  %v232_v4 = vsel %vm225_vm0, %v842_v1, 0.0  ;;  %v852_v5 = vld [vmem:[%s836_s18 + $0x18] sm:$0xff]  ;;  %v229_v6 = vsel %vm225_vm0, %v845_v2, 0.0  ;;  %v859_v8 = vld [vmem:[%s836_s18 + $0x20] sm:$0xff]  ;;  %v862_v9 = vld [vmem:[%s836_s18 + $0x28] sm:$0xff] }
  0x10   : > { %227 = vadd.xlane.f32.xlu0 %v226_v3  ;;  %233 = vadd.xlane.f32.xlu1 %v232_v4  ;;  %v235_v7 = vsel %vm225_vm0, %v852_v5, 0.0  ;;  %v238_v10 = vsel %vm225_vm0, %v859_v8, 0.0  ;;  %v241_v11 = vsel %vm225_vm0, %v862_v9, 0.0  ;;  %v869_v12 = vld [vmem:[%s836_s18 + $0x30] sm:$0xff]  ;;  %v872_v13 = vld [vmem:[%s836_s18 + $0x38] sm:$0xff]  ;;  %v879_v16 = vld [vmem:[%s836_s18 + $0x40] sm:$0xff] }
  0x11   : > { %v244_v14 = vsel %vm225_vm0, %v869_v12, 0.0  ;;  %v247_v15 = vsel %vm225_vm0, %v872_v13, 0.0  ;;  %v882_v17 = vld [vmem:[%s836_s18 + $0x48] sm:$0xff]  ;;  %v250_v18 = vsel %vm225_vm0, %v879_v16, 0.0  ;;  %v889_v20 = vld [vmem:[%s836_s18 + $0x50] sm:$0xff]  ;;  %v892_v21 = vld [vmem:[%s836_s18 + $0x58] sm:$0xff] }
  0x12   : > { %v253_v19 = vsel %vm225_vm0, %v882_v17, 0.0  ;;  %v256_v22 = vsel %vm225_vm0, %v889_v20, 0.0  ;;  %v259_v23 = vsel %vm225_vm0, %v892_v21, 0.0  ;;  %v899_v24 = vld [vmem:[%s836_s18 + $0x60] sm:$0xff]  ;;  %v902_v25 = vld [vmem:[%s836_s18 + $0x68] sm:$0xff]  ;;  %v909_v28 = vld [vmem:[%s836_s18 + $0x70] sm:$0xff] }
  0x13   : > { %v262_v26 = vsel %vm225_vm0, %v899_v24, 0.0  ;;  %v265_v27 = vsel %vm225_vm0, %v902_v25, 0.0  ;;  %v912_v29 = vld [vmem:[%s836_s18 + $0x78] sm:$0xff]  ;;  %v268_v30 = vsel %vm225_vm0, %v909_v28, 0.0 }
  0x14   : > { %230 = vadd.xlane.f32.xlu0 %v229_v6  ;;  %236 = vadd.xlane.f32.xlu1 %v235_v7  ;;  %v271_v31 = vsel %vm225_vm0, %v912_v29, 0.0 }
  0x18   : > { %239 = vadd.xlane.f32.xlu0 %v238_v10  ;;  %242 = vadd.xlane.f32.xlu1 %v241_v11 }
  0x1c   : > { %245 = vadd.xlane.f32.xlu0 %v244_v14  ;;  %248 = vadd.xlane.f32.xlu1 %v247_v15 }
  0x20   : > { %251 = vadd.xlane.f32.xlu0 %v250_v18  ;;  %254 = vadd.xlane.f32.xlu1 %v253_v19 }
  0x24   : > { %257 = vadd.xlane.f32.xlu0 %v256_v22  ;;  %260 = vadd.xlane.f32.xlu1 %v259_v23 }
  0x28   : > { %263 = vadd.xlane.f32.xlu0 %v262_v26  ;;  %266 = vadd.xlane.f32.xlu1 %v265_v27 }
  0x2c   : > { %269 = vadd.xlane.f32.xlu0 %v268_v30  ;;  %272 = vadd.xlane.f32.xlu1 %v271_v31 }
  0x99   : > { %v228_v32 = vpop.xlane.xlu0 %227  ;;  %v234_v33 = vpop.xlane.xlu1 %233 }
  0x9a   : > { %v918_v34 = vmul.f32 0.020408163, %v228_v32  ;;  %v920_v35 = vmul.f32 0.020408163, %v234_v33 }
  0x9c   : > { %v290_v36 = vsub.f32 %v839_v0, %v918_v34  ;;  %v292_v37 = vsub.f32 %v842_v1, %v920_v35 }
  0x9d   : > { %v231_v38 = vpop.xlane.xlu0 %230  ;;  %v237_v39 = vpop.xlane.xlu1 %236 }
  0x9e   : > { %v926_v40 = vmul.f32 0.020408163, %v231_v38  ;;  %v928_v41 = vmul.f32 0.020408163, %v237_v39  ;;  %v306_v42 = vmul.f32 %v290_v36, %v290_v36  ;;  %v308_v43 = vmul.f32 %v292_v37, %v292_v37 }
  0xa0   : > { %v291_v44 = vsub.f32 %v845_v2, %v926_v40  ;;  %v293_v45 = vsub.f32 %v852_v5, %v928_v41  ;;  %v322_v46 = vsel %vm225_vm0, %v306_v42, 0.0  ;;  %v328_v49 = vsel %vm225_vm0, %v308_v43, 0.0 }
  0xa1   : > { %323 = vadd.xlane.f32.xlu0 %v322_v46  ;;  %v240_v47 = vpop.xlane.xlu0 %239  ;;  %v243_v48 = vpop.xlane.xlu1 %242 }
  0xa2   : > { %v936_v50 = vmul.f32 0.020408163, %v240_v47  ;;  %v938_v51 = vmul.f32 0.020408163, %v243_v48  ;;  %v307_v52 = vmul.f32 %v291_v44, %v291_v44  ;;  %v309_v53 = vmul.f32 %v293_v45, %v293_v45 }
  0xa4   : > { %v294_v54 = vsub.f32 %v859_v8, %v936_v50  ;;  %v295_v55 = vsub.f32 %v862_v9, %v938_v51  ;;  %v325_v56 = vsel %vm225_vm0, %v307_v52, 0.0  ;;  %v331_v59 = vsel %vm225_vm0, %v309_v53, 0.0 }
  0xa5   : > { %329 = vadd.xlane.f32.xlu0 %v328_v49  ;;  %326 = vadd.xlane.f32.xlu1 %v325_v56  ;;  %v246_v57 = vpop.xlane.xlu0 %245  ;;  %v249_v58 = vpop.xlane.xlu1 %248 }
  0xa6   : > { %v946_v60 = vmul.f32 0.020408163, %v246_v57  ;;  %v948_v61 = vmul.f32 0.020408163, %v249_v58  ;;  %v310_v62 = vmul.f32 %v294_v54, %v294_v54  ;;  %v311_v63 = vmul.f32 %v295_v55, %v295_v55 }
  0xa8   : > { %v296_v3 = vsub.f32 %v869_v12, %v946_v60  ;;  %v297_v4 = vsub.f32 %v872_v13, %v948_v61  ;;  %v334_v6 = vsel %vm225_vm0, %v310_v62, 0.0  ;;  %v337_v11 = vsel %vm225_vm0, %v311_v63, 0.0 }
  0xa9   : > { %332 = vadd.xlane.f32.xlu1 %v331_v59  ;;  %335 = vadd.xlane.f32.xlu0 %v334_v6  ;;  %v252_v7 = vpop.xlane.xlu0 %251  ;;  %v255_v10 = vpop.xlane.xlu1 %254 }
  0xaa   : > { %v956_v14 = vmul.f32 0.020408163, %v252_v7  ;;  %v958_v15 = vmul.f32 0.020408163, %v255_v10  ;;  %v312_v18 = vmul.f32 %v296_v3, %v296_v3  ;;  %v313_v19 = vmul.f32 %v297_v4, %v297_v4 }
  0xac   : > { %v298_v22 = vsub.f32 %v879_v16, %v956_v14  ;;  %v299_v23 = vsub.f32 %v882_v17, %v958_v15  ;;  %v340_v26 = vsel %vm225_vm0, %v312_v18, 0.0  ;;  %v343_v31 = vsel %vm225_vm0, %v313_v19, 0.0 }
  0xad   : > { %338 = vadd.xlane.f32.xlu1 %v337_v11  ;;  %341 = vadd.xlane.f32.xlu0 %v340_v26  ;;  %v258_v27 = vpop.xlane.xlu0 %257  ;;  %v261_v30 = vpop.xlane.xlu1 %260 }
  0xae   : > { %v966_v32 = vmul.f32 0.020408163, %v258_v27  ;;  %v968_v33 = vmul.f32 0.020408163, %v261_v30  ;;  %v314_v36 = vmul.f32 %v298_v22, %v298_v22  ;;  %v315_v37 = vmul.f32 %v299_v23, %v299_v23 }
  0xaf   : > { %v797_v22 = vmov 0  }
  0xb0   : > { %v300_v38 = vsub.f32 %v889_v20, %v966_v32  ;;  %v301_v39 = vsub.f32 %v892_v21, %v968_v33  ;;  %v346_v42 = vsel %vm225_vm0, %v314_v36, 0.0  ;;  %v349_v45 = vsel %vm225_vm0, %v315_v37, 0.0  ;;  %755 = vset.pattern.permute.xlu0 %v797_v22  ;;  %756 = vset.pattern.permute.xlu1 %v797_v22 }
  0xb1   : > { %344 = vadd.xlane.f32.xlu1 %v343_v31  ;;  %347 = vadd.xlane.f32.xlu0 %v346_v42  ;;  %v264_v43 = vpop.xlane.xlu0 %263  ;;  %v267_v44 = vpop.xlane.xlu1 %266 }
  0xb2   : > { %v976_v46 = vmul.f32 0.020408163, %v264_v43  ;;  %v978_v47 = vmul.f32 0.020408163, %v267_v44  ;;  %v316_v48 = vmul.f32 %v300_v38, %v300_v38  ;;  %v317_v49 = vmul.f32 %v301_v39, %v301_v39 }
  0xb4   : > { %v302_v52 = vsub.f32 %v899_v24, %v976_v46  ;;  %v303_v53 = vsub.f32 %v902_v25, %v978_v47  ;;  %v352_v54 = vsel %vm225_vm0, %v316_v48, 0.0  ;;  %v355_v57 = vsel %vm225_vm0, %v317_v49, 0.0 }
  0xb5   : > { %350 = vadd.xlane.f32.xlu1 %v349_v45  ;;  %353 = vadd.xlane.f32.xlu0 %v352_v54  ;;  %v270_v55 = vpop.xlane.xlu0 %269  ;;  %v273_v56 = vpop.xlane.xlu1 %272 }
  0xb6   : > { %v986_v58 = vmul.f32 0.020408163, %v270_v55  ;;  %v988_v59 = vmul.f32 0.020408163, %v273_v56  ;;  %v318_v62 = vmul.f32 %v302_v52, %v302_v52  ;;  %v319_v63 = vmul.f32 %v303_v53, %v303_v53  ;;  %v176_v56 = vld [vmem:[%s1006_s22] sm:$0xff] }
  0xb8   : > { %v304_v3 = vsub.f32 %v909_v28, %v986_v58  ;;  %v305_v4 = vsub.f32 %v912_v29, %v988_v59  ;;  %v358_v6 = vsel %vm225_vm0, %v318_v62, 0.0  ;;  %v361_v7 = vsel %vm225_vm0, %v319_v63, 0.0 }
  0xb9   : > { %356 = vadd.xlane.f32.xlu1 %v355_v57  ;;  %359 = vadd.xlane.f32.xlu0 %v358_v6 }
  0xba   : > { %v320_v10 = vmul.f32 %v304_v3, %v304_v3  ;;  %v321_v11 = vmul.f32 %v305_v4, %v305_v4 }
  0xbc   : > { %v364_v18 = vsel %vm225_vm0, %v320_v10, 0.0  ;;  %v367_v19 = vsel %vm225_vm0, %v321_v11, 0.0 }
  0xbd   : > { %362 = vadd.xlane.f32.xlu1 %v361_v7  ;;  %365 = vadd.xlane.f32.xlu0 %v364_v18  ;;  %v177_v7 = vld [vmem:[%s1006_s22 + $0x8] sm:$0xff] }
  0xc1   : > { %368 = vadd.xlane.f32.xlu1 %v367_v19 }
 0x12a   : > { %v324_v23 = vpop.xlane.xlu0 %323 }
 0x12b   : > { %v370_v26 = vmul.f32 0.020408163, %v324_v23 }
 0x12d   : > { %v386_v27 = vadd.f32 0.001, %v370_v26 }
 0x12e   : > { %v327_v30 = vpop.xlane.xlu1 %326  ;;  %v330_v31 = vpop.xlane.xlu0 %329 }
 0x12f   : > { %757 = vrsqrt.f32 %v386_v27  ;;  %v371_v36 = vmul.f32 0.020408163, %v327_v30  ;;  %v372_v37 = vmul.f32 0.020408163, %v330_v31  ;;  %v178_v31 = vld [vmem:[%s1006_s22 + $0x10] sm:$0xff] }
 0x131   : > { %v387_v38 = vadd.f32 0.001, %v371_v36  ;;  %v388_v39 = vadd.f32 0.001, %v372_v37 }
 0x132   : > { %v333_v42 = vpop.xlane.xlu1 %332  ;;  %v336_v43 = vpop.xlane.xlu0 %335 }
 0x133   : > { %759 = vrsqrt.f32 %v387_v38  ;;  %v373_v44 = vmul.f32 0.020408163, %v333_v42  ;;  %v374_v48 = vmul.f32 0.020408163, %v336_v43 }
 0x134   : > { %761 = vrsqrt.f32 %v388_v39 }
 0x135   : > { %v389_v45 = vadd.f32 0.001, %v373_v44  ;;  %v390_v53 = vadd.f32 0.001, %v374_v48 }
 0x136   : > { %v339_v49 = vpop.xlane.xlu1 %338  ;;  %v342_v52 = vpop.xlane.xlu0 %341 }
 0x137   : > { %763 = vrsqrt.f32 %v389_v45  ;;  %v375_v54 = vmul.f32 0.020408163, %v339_v49  ;;  %v376_v62 = vmul.f32 0.020408163, %v342_v52  ;;  %v179_v45 = vld [vmem:[%s1006_s22 + $0x18] sm:$0xff] }
 0x138   : > { %765 = vrsqrt.f32 %v390_v53 }
 0x139   : > { %v391_v3 = vadd.f32 0.001, %v375_v54  ;;  %v392_v18 = vadd.f32 0.001, %v376_v62  ;;  %v180_v62 = vld [vmem:[%s1006_s22 + $0x20] sm:$0xff] }
 0x13a   : > { %v345_v55 = vpop.xlane.xlu1 %344  ;;  %v348_v63 = vpop.xlane.xlu0 %347 }
 0x13b   : > { %767 = vrsqrt.f32 %v391_v3  ;;  %v377_v19 = vmul.f32 0.020408163, %v345_v55  ;;  %v378_v37 = vmul.f32 0.020408163, %v348_v63 }
 0x13c   : > { %v758_v57 = vpop.eup %757 }
 0x13d   : > { %v1009_v4 = vmul.f32 %v758_v57, %v176_v56  ;;  %v393_v38 = vadd.f32 0.001, %v377_v19  ;;  %v394_v53 = vadd.f32 0.001, %v378_v37  ;;  %v185_v19 = vld [vmem:[%s1006_s22 + $0x48] sm:$0xff] }
 0x13e   : > { %v351_v6 = vpop.xlane.xlu1 %350  ;;  %v354_v27 = vpop.xlane.xlu0 %353 }
 0x13f   : > { %v379_v10 = vmul.f32 0.020408163, %v351_v6  ;;  %468 = vperm.xlu0 %755, %v1009_v4   ;;  %v380_v49 = vmul.f32 0.020408163, %v354_v27 }
 0x140   : > { %v760_v11 = vpop.eup %759 }
 0x141   : > { %v395_v22 = vadd.f32 0.001, %v379_v10  ;;  %v1013_v23 = vmul.f32 %v760_v11, %v177_v7  ;;  %v762_v26 = vpop.eup %761  ;;  %v396_v3 = vadd.f32 0.001, %v380_v49 }
 0x142   : > { %v357_v30 = vpop.xlane.xlu1 %356  ;;  %v1017_v42 = vmul.f32 %v762_v26, %v178_v31  ;;  %v360_v52 = vpop.xlane.xlu0 %359 }
 0x143   : > { %769 = vrsqrt.f32 %v395_v22  ;;  %v381_v36 = vmul.f32 0.020408163, %v357_v30  ;;  %473 = vperm.xlu1 %756, %v1013_v23   ;;  %v382_v6 = vmul.f32 0.020408163, %v360_v52  ;;  %v181_v22 = vld [vmem:[%s1006_s22 + $0x28] sm:$0xff] }
 0x144   : > { %771 = vrsqrt.f32 %v392_v18  ;;  %v764_v43 = vpop.eup %763  ;;  %v189_v52 = vld [vmem:[%s1006_s22 + $0x68] sm:$0xff] }
 0x145   : > { %v397_v39 = vadd.f32 0.001, %v381_v36  ;;  %v421_v55 = vmul.f32 %v764_v43, %v179_v45  ;;  %v766_v56 = vpop.eup %765  ;;  %v398_v27 = vadd.f32 0.001, %v382_v6 }
 0x146   : > { %v363_v44 = vpop.xlane.xlu1 %362  ;;  %v1022_v10 = vmul.f32 %v766_v56, %v180_v62  ;;  %v366_v18 = vpop.xlane.xlu0 %365 }
 0x147   : > { %773 = vrsqrt.f32 %v397_v39  ;;  %v383_v48 = vmul.f32 0.020408163, %v363_v44  ;;  %478 = vperm.xlu1 %756, %v1017_v42   ;;  %v384_v30 = vmul.f32 0.020408163, %v366_v18  ;;  %v182_v39 = vld [vmem:[%s1006_s22 + $0x30] sm:$0xff] }
 0x148   : > { %775 = vrsqrt.f32 %v393_v38  ;;  %v768_v11 = vpop.eup %767  ;;  %v187_v38 = vld [vmem:[%s1006_s22 + $0x58] sm:$0xff] }
 0x149   : > { %v399_v54 = vadd.f32 0.001, %v383_v48  ;;  %v423_v36 = vmul.f32 %v768_v11, %v181_v22  ;;  %v400_v44 = vadd.f32 0.001, %v384_v30  ;;  %v194_v22 = vld [vmem:[%s1040_s25 + $0x8] sm:$0xff] }
 0x14a   : > { %v369_v57 = vpop.xlane.xlu1 %368 }
 0x14b   : > { %777 = vrsqrt.f32 %v399_v54  ;;  %v385_v63 = vmul.f32 0.020408163, %v369_v57  ;;  %483 = vperm.xlu1 %756, %v421_v55  }
 0x14c   : > { %779 = vrsqrt.f32 %v394_v53  ;;  %v183_v53 = vld [vmem:[%s1006_s22 + $0x38] sm:$0xff] }
 0x14d   : > { %v401_v7 = vadd.f32 0.001, %v385_v63  ;;  %v191_v63 = vld [vmem:[%s1006_s22 + $0x78] sm:$0xff] }
 0x14f   : > { %781 = vrsqrt.f32 %v401_v7  ;;  %488 = vperm.xlu1 %756, %v1022_v10  }
 0x150   : > { %v770_v26 = vpop.eup %769  ;;  %783 = vrsqrt.f32 %v396_v3  ;;  %v184_v3 = vld [vmem:[%s1006_s22 + $0x40] sm:$0xff] }
 0x151   : > { %v427_v31 = vmul.f32 %v770_v26, %v185_v19  ;;  %v772_v37 = vpop.eup %771  ;;  %785 = vrsqrt.f32 %v398_v27  ;;  %v435_v19 = vmul.f32 %v1013_v23, %v926_v40  ;;  %v186_v26 = vld [vmem:[%s1006_s22 + $0x50] sm:$0xff]  ;;  %v439_v40 = vmul.f32 %v423_v36, %v938_v51 }
 0x152   : > { %v1029_v48 = vmul.f32 %v772_v37, %v182_v39  ;;  %787 = vrsqrt.f32 %v400_v44  ;;  %v437_v37 = vmul.f32 %v421_v55, %v928_v41  ;;  %v196_v39 = vld [vmem:[%s1040_s25 + $0x18] sm:$0xff] }
 0x153   : > { %513 = vperm.xlu0 %755, %v427_v31   ;;  %493 = vperm.xlu1 %756, %v423_v36   ;;  %v451_v27 = vsub.f32 %v194_v22, %v435_v19  ;;  %v202_v19 = vld [vmem:[%s1040_s25 + $0x48] sm:$0xff]  ;;  %v195_v22 = vld [vmem:[%s1040_s25 + $0x10] sm:$0xff] }
 0x154   : > { %v774_v43 = vpop.eup %773  ;;  %v453_v44 = vsub.f32 %v196_v39, %v437_v37  ;;  %v206_v37 = vld [vmem:[%s1040_s25 + $0x68] sm:$0xff]  ;;  %v208_v39 = vld [vmem:[%s1040_s25 + $0x78] sm:$0xff] }
 0x155   : > { %v429_v45 = vmul.f32 %v774_v43, %v187_v38  ;;  %v776_v49 = vpop.eup %775  ;;  %v188_v43 = vld [vmem:[%s1006_s22 + $0x60] sm:$0xff] }
 0x156   : > { %v425_v57 = vmul.f32 %v776_v49, %v183_v53  ;;  %v190_v53 = vld [vmem:[%s1006_s22 + $0x70] sm:$0xff] }
 0x157   : > { %523 = vperm.xlu0 %755, %v429_v45   ;;  %498 = vperm.xlu1 %756, %v1029_v48  }
 0x158   : > { %v778_v54 = vpop.eup %777  ;;  %v441_v55 = vmul.f32 %v425_v57, %v948_v61 }
 0x159   : > { %v431_v56 = vmul.f32 %v778_v54, %v189_v52  ;;  %v780_v62 = vpop.eup %779  ;;  %v198_v52 = vld [vmem:[%s1040_s25 + $0x28] sm:$0xff] }
 0x15a   : > { %v426_v18 = vmul.f32 %v780_v62, %v184_v3  ;;  %v455_v54 = vsub.f32 %v198_v52, %v439_v40  ;;  %v434_v62 = vmul.f32 %v1009_v4, %v918_v34  ;;  %v193_v3 = vld [vmem:[%s1040_s25] sm:$0xff]  ;;  %v445_v4 = vmul.f32 %v429_v45, %v968_v33 }
 0x15b   : > { %533 = vperm.xlu0 %755, %v431_v56   ;;  %503 = vperm.xlu1 %756, %v425_v57   ;;  %v438_v57 = vmul.f32 %v1022_v10, %v936_v50 }
 0x15c   : > { %v782_v6 = vpop.eup %781  ;;  %v450_v36 = vsub.f32 %v193_v3, %v434_v62  ;;  %v442_v45 = vmul.f32 %v426_v18, %v956_v14 }
 0x15d   : > { %v784_v7 = vpop.eup %783  ;;  %v433_v11 = vmul.f32 %v782_v6, %v191_v63  ;;  %v200_v63 = vld [vmem:[%s1040_s25 + $0x38] sm:$0xff]  ;;  %v443_v6 = vmul.f32 %v427_v31, %v958_v15  ;;  %v440_v31 = vmul.f32 %v1029_v48, %v946_v60  ;;  %v203_v48 = vld [vmem:[%s1040_s25 + $0x50] sm:$0xff] }
 0x15e   : > { %v428_v30 = vmul.f32 %v784_v7, %v186_v26  ;;  %v786_v38 = vpop.eup %785  ;;  %v457_v51 = vsub.f32 %v200_v63, %v441_v55  ;;  %v436_v7 = vmul.f32 %v1017_v42, %v920_v35  ;;  %v204_v26 = vld [vmem:[%s1040_s25 + $0x58] sm:$0xff]  ;;  %v447_v42 = vmul.f32 %v431_v56, %v978_v47 }
 0x15f   : > { %543 = vperm.xlu0 %755, %v433_v11   ;;  %508 = vperm.xlu1 %756, %v426_v18   ;;  %v430_v49 = vmul.f32 %v786_v38, %v188_v43  ;;  %v788_v23 = vpop.eup %787  ;;  %v459_v34 = vsub.f32 %v202_v19, %v443_v6  ;;  %v461_v35 = vsub.f32 %v204_v26, %v445_v4  ;;  %v199_v38 = vld [vmem:[%s1040_s25 + $0x30] sm:$0xff]  ;;  %v201_v43 = vld [vmem:[%s1040_s25 + $0x40] sm:$0xff] }
 0x160   : > { %v432_v41 = vmul.f32 %v788_v23, %v190_v53  ;;  %v452_v61 = vsub.f32 %v195_v22, %v436_v7  ;;  %v463_v33 = vsub.f32 %v206_v37, %v447_v42  ;;  %v456_v50 = vsub.f32 %v199_v38, %v440_v31  ;;  %v205_v23 = vld [vmem:[%s1040_s25 + $0x60] sm:$0xff] }
 0x161   : > { %v449_v10 = vmul.f32 %v433_v11, %v988_v59  ;;  %v458_v56 = vsub.f32 %v201_v43, %v442_v45  ;;  %v444_v60 = vmul.f32 %v428_v30, %v966_v32  ;;  %v446_v40 = vmul.f32 %v430_v49, %v976_v46  ;;  %v207_v11 = vld [vmem:[%s1040_s25 + $0x70] sm:$0xff] }
 0x162   : > { %v448_v14 = vmul.f32 %v432_v41, %v986_v58 }
 0x163   : > { %569 = vperm.xlu0 %755, %v451_v27   ;;  %518 = vperm.xlu1 %756, %v428_v30   ;;  %v197_v27 = vld [vmem:[%s1040_s25 + $0x20] sm:$0xff]  ;;  %v465_v47 = vsub.f32 %v208_v39, %v449_v10  ;;  %v462_v59 = vsub.f32 %v205_v23, %v446_v40 }
 0x164   : > { %v454_v15 = vsub.f32 %v197_v27, %v438_v57  ;;  %v464_v18 = vsub.f32 %v207_v11, %v448_v14 }
 0x167   : > { %579 = vperm.xlu0 %755, %v453_v44   ;;  %528 = vperm.xlu1 %756, %v430_v49   ;;  %v460_v44 = vsub.f32 %v203_v48, %v444_v60 }
 0x16b   : > { %589 = vperm.xlu0 %755, %v455_v54   ;;  %538 = vperm.xlu1 %756, %v432_v41  }
 0x16f   : > { %599 = vperm.xlu0 %755, %v457_v51   ;;  %564 = vperm.xlu1 %756, %v450_v36  }
 0x173   : > { %609 = vperm.xlu0 %755, %v459_v34   ;;  %574 = vperm.xlu1 %756, %v452_v61  }
 0x177   : > { %619 = vperm.xlu0 %755, %v461_v35   ;;  %584 = vperm.xlu1 %756, %v454_v15  }
 0x17b   : > { %629 = vperm.xlu0 %755, %v463_v33   ;;  %594 = vperm.xlu1 %756, %v456_v50  }
 0x17f   : > { %639 = vperm.xlu0 %755, %v465_v47   ;;  %604 = vperm.xlu1 %756, %v458_v56  }
 0x183   : > { %614 = vperm.xlu1 %756, %v460_v44  }
 0x187   : > { %624 = vperm.xlu1 %756, %v462_v59  }
 0x18b   : > { %634 = vperm.xlu1 %756, %v464_v18  }
 0x1ba   : > { %v469_v32 = vpop.permute.xlu0 %468 }
 0x1bb   : > { %v546_v27 = vmul.f32 %v469_v32, %v839_v0 }
 0x1be   : > { %v474_v52 = vpop.permute.xlu1 %473 }
 0x1bf   : > { %v547_v58 = vmul.f32 %v474_v52, %v845_v2 }
 0x1c2   : > { %v479_v53 = vpop.permute.xlu1 %478 }
 0x1c3   : > { %v548_v37 = vmul.f32 %v479_v53, %v842_v1 }
 0x1c6   : > { %v484_v54 = vpop.permute.xlu1 %483 }
 0x1c7   : > { %v549_v19 = vmul.f32 %v484_v54, %v852_v5 }
 0x1ca   : > { %v489_v30 = vpop.permute.xlu1 %488 }
 0x1cb   : > { %v550_v50 = vmul.f32 %v489_v30, %v859_v8 }
 0x1ce   : > { %v494_v55 = vpop.permute.xlu1 %493  ;;  %v514_v62 = vpop.permute.xlu0 %513 }
 0x1cf   : > { %v551_v61 = vmul.f32 %v494_v55, %v862_v9  ;;  %v555_v9 = vmul.f32 %v514_v62, %v882_v17 }
 0x1d2   : > { %v499_v63 = vpop.permute.xlu1 %498  ;;  %v524_v3 = vpop.permute.xlu0 %523 }
 0x1d3   : > { %v557_v10 = vmul.f32 %v524_v3, %v892_v21  ;;  %v552_v43 = vmul.f32 %v499_v63, %v869_v12 }
 0x1d6   : > { %v504_v46 = vpop.permute.xlu1 %503  ;;  %v534_v49 = vpop.permute.xlu0 %533 }
 0x1d7   : > { %v553_v35 = vmul.f32 %v504_v46, %v872_v13  ;;  %v559_v47 = vmul.f32 %v534_v49, %v902_v25 }
 0x1da   : > { %v509_v51 = vpop.permute.xlu1 %508  ;;  %v544_v36 = vpop.permute.xlu0 %543 }
 0x1db   : > { %v554_v48 = vmul.f32 %v509_v51, %v879_v16  ;;  %v561_v44 = vmul.f32 %v544_v36, %v912_v29 }
 0x1de   : > { %v519_v41 = vpop.permute.xlu1 %518  ;;  %v570_v6 = vpop.permute.xlu0 %569 }
 0x1df   : > { %v643_v7 = vadd.f32 %v570_v6, %v547_v58  ;;  %v556_v59 = vmul.f32 %v519_v41, %v889_v20 }
 0x1e1   : > { %659 = vst.msk [vmem:[%s1088_s28 + $0x8] sm:$0xff] %vm225_vm0, %v643_v7 }
 0x1e2   : > { %v529_v22 = vpop.permute.xlu1 %528  ;;  %v580_v34 = vpop.permute.xlu0 %579 }
 0x1e3   : > { %v645_v2 = vadd.f32 %v580_v34, %v549_v19  ;;  %v558_v29 = vmul.f32 %v529_v22, %v899_v24 }
 0x1e5   : > { %661 = vst.msk [vmem:[%s1088_s28 + $0x18] sm:$0xff] %vm225_vm0, %v645_v2 }
 0x1e6   : > { %v539_v4 = vpop.permute.xlu1 %538  ;;  %v590_v57 = vpop.permute.xlu0 %589 }
 0x1e7   : > { %v647_v26 = vadd.f32 %v590_v57, %v551_v61  ;;  %v560_v52 = vmul.f32 %v539_v4, %v909_v28 }
 0x1e9   : > { %663 = vst.msk [vmem:[%s1088_s28 + $0x28] sm:$0xff] %vm225_vm0, %v647_v26 }
 0x1ea   : > { %v565_v5 = vpop.permute.xlu1 %564  ;;  %v600_v15 = vpop.permute.xlu0 %599 }
 0x1eb   : > { %v642_v42 = vadd.f32 %v565_v5, %v546_v27  ;;  %v649_v31 = vadd.f32 %v600_v15, %v553_v35 }
 0x1ed   : > { %658 = vst.msk [vmem:[%s1088_s28] sm:$0xff] %vm225_vm0, %v642_v42  ;;  %665 = vst.msk [vmem:[%s1088_s28 + $0x38] sm:$0xff] %vm225_vm0, %v649_v31 }
 0x1ee   : > { %v575_v0 = vpop.permute.xlu1 %574  ;;  %v610_v13 = vpop.permute.xlu0 %609 }
 0x1ef   : > { %v644_v38 = vadd.f32 %v575_v0, %v548_v37  ;;  %v651_v33 = vadd.f32 %v610_v13, %v555_v9 }
 0x1f1   : > { %660 = vst.msk [vmem:[%s1088_s28 + $0x10] sm:$0xff] %vm225_vm0, %v644_v38  ;;  %667 = vst.msk [vmem:[%s1088_s28 + $0x48] sm:$0xff] %vm225_vm0, %v651_v33 }
 0x1f2   : > { %v585_v1 = vpop.permute.xlu1 %584  ;;  %v620_v17 = vpop.permute.xlu0 %619 }
 0x1f3   : > { %v646_v45 = vadd.f32 %v585_v1, %v550_v50  ;;  %v653_v39 = vadd.f32 %v620_v17, %v557_v10 }
 0x1f5   : > { %662 = vst.msk [vmem:[%s1088_s28 + $0x20] sm:$0xff] %vm225_vm0, %v646_v45  ;;  %669 = vst.msk [vmem:[%s1088_s28 + $0x58] sm:$0xff] %vm225_vm0, %v653_v39 }
 0x1f6   : > { %v595_v8 = vpop.permute.xlu1 %594  ;;  %v630_v21 = vpop.permute.xlu0 %629 }
 0x1f7   : > { %v648_v56 = vadd.f32 %v595_v8, %v552_v43  ;;  %v655_v60 = vadd.f32 %v630_v21, %v559_v47 }
 0x1f9   : > { %664 = vst.msk [vmem:[%s1088_s28 + $0x30] sm:$0xff] %vm225_vm0, %v648_v56  ;;  %671 = vst.msk [vmem:[%s1088_s28 + $0x68] sm:$0xff] %vm225_vm0, %v655_v60 }
 0x1fa   : > { %v605_v12 = vpop.permute.xlu1 %604  ;;  %v640_v25 = vpop.permute.xlu0 %639 }
 0x1fb   : > { %v650_v40 = vadd.f32 %v605_v12, %v554_v48  ;;  %v657_v23 = vadd.f32 %v640_v25, %v561_v44 }
 0x1fd   : > { %666 = vst.msk [vmem:[%s1088_s28 + $0x40] sm:$0xff] %vm225_vm0, %v650_v40  ;;  %673 = vst.msk [vmem:[%s1088_s28 + $0x78] sm:$0xff] %vm225_vm0, %v657_v23 }
 0x1fe   : > { %v615_v14 = vpop.permute.xlu1 %614 }
 0x1ff   : > { %v652_v16 = vadd.f32 %v615_v14, %v556_v59 }
 0x201   : > { %668 = vst.msk [vmem:[%s1088_s28 + $0x50] sm:$0xff] %vm225_vm0, %v652_v16 }
 0x202   : > { %v625_v11 = vpop.permute.xlu1 %624 }
 0x203   : > { %v654_v18 = vadd.f32 %v625_v11, %v558_v29 }
 0x205   : > { %670 = vst.msk [vmem:[%s1088_s28 + $0x60] sm:$0xff] %vm225_vm0, %v654_v18 }
 0x206   : > { %v635_v53 = vpop.permute.xlu1 %634 }
 0x207   : > { %v656_v54 = vadd.f32 %v635_v53, %v560_v52 }
 0x209   : > { %672 = vst.msk [vmem:[%s1088_s28 + $0x70] sm:$0xff] %vm225_vm0, %v656_v54 }
 0x20a PF: > { %s13_s12 = sadd.s32 1, %s795_s12  }
 0x20b   : > { %p10_p4 = scmp.ge.s32.totalorder %s13_s12, 4  }
 0x20d   :  { %12 = sbr.rel (!%p10_p4) target bundleno = 1 (0x1), region = 64 }

</bundles_post_ra>
